<compile_context>
chip_gen: v7x
topology: tpu7x:2x2x1
jax: 0.10.0
libtpu: 0.0.40
codegen_flags: <defaults>
</compile_context>

<pallas_src>
import jax
import jax.numpy as jnp
from jax.experimental import pallas as pl
from jax.experimental.pallas import tpu as pltpu


def _cnn_feat_kernel(x_ref, w_ref, b_ref, o_ref, lhs_ref):
    # x_ref:   (1, M, C_in)   bf16   M = batch_block * T rows (batch-major, channels-last)
    # w_ref:   (K_pad, C_pad) bf16   conv taps stacked along K, zero rows for K >= 3*C_in
    # b_ref:   (1, C_pad)     f32
    # o_ref:   (1, BB, C_pad) f32
    # lhs_ref: (M, K_pad)     bf16   VMEM scratch used as the matmul LHS
    _, M, C_in = x_ref.shape
    BB, C_pad = o_ref.shape[1], o_ref.shape[2]
    T = M // BB
    K = 3 * C_in
    K_pad = lhs_ref.shape[1]

    x = x_ref[0]                                   # (M, C_in) bf16 straight from HBM
    xf = x.astype(jnp.float32)                     # rolls/masks in f32 (free under HBM bound)

    # Per-batch-element time index of each row (conv boundary + pool parity masks).
    t_idx = jax.lax.broadcasted_iota(jnp.int32, (M, 1), 0) % T

    # Conv padding=1 handled in-kernel: tap0 reads x[t-1], tap2 reads x[t+1]; rows that
    # would cross a batch-element (or block) boundary are zeroed.
    left = jnp.where(t_idx > 0, pltpu.roll(xf, shift=1, axis=0), 0.0)           # x[t-1]
    right = jnp.where(t_idx < T - 1, pltpu.roll(xf, shift=M - 1, axis=0), 0.0)  # x[t+1]

    # im2col: write the 3 taps into fixed lane slices of the bf16 LHS scratch.
    # Padding lanes [K:K_pad] are zeroed every step (cheap; keeps the scratch safe under
    # megacore sharding where step 0 runs on only one TensorCore).
    if K_pad > K:
        lhs_ref[:, K:] = jnp.zeros((M, K_pad - K), jnp.bfloat16)
    lhs_ref[:, 0:C_in] = left.astype(jnp.bfloat16)
    lhs_ref[:, C_in:2 * C_in] = x
    lhs_ref[:, 2 * C_in:3 * C_in] = right.astype(jnp.bfloat16)

    # Single K = K_pad MXU matmul (bf16 in, f32 acc), bias + ReLU in f32.
    y = jnp.dot(lhs_ref[...], w_ref[...], preferred_element_type=jnp.float32)   # (M, C_pad)
    y = jnp.maximum(y + b_ref[...], 0.0)

    # MaxPool1d(k=2, s=2): even row 2p <- max(y[2p], y[2p+1]) via an XLU roll, then
    # per-batch mean over the T//2 pooled rows (parity-masked sum * 2/T).
    ymax = jnp.maximum(y, pltpu.roll(y, shift=M - 1, axis=0))
    pooled = jnp.where(t_idx % 2 == 0, ymax, 0.0)
    o_ref[0] = pooled.reshape(BB, T, C_pad).sum(axis=1) * (2.0 / T)


def _pick_batch_block(B, T, target_rows=1024):
    """Largest divisor of B with batch_block*T <= ~target_rows, keeping >= 2 grid steps
    whenever B >= 2 (so the parallel grid axis can use both v7x TensorCores)."""
    cap = max(1, target_rows // T)
    if B >= 2:
        cap = min(cap, B // 2)
    cap = max(cap, 1)
    bb = 1
    for d in range(1, min(cap, B) + 1):
        if B % d == 0:
            bb = d
    return bb


def cnn_feature_extractor(x, w, b, *, target_rows=1024):
    """x: (B, T, C_in) f32, w: (3, C_in, C_out), b: (C_out,). Returns (B, C_out) f32."""
    B, T, C_in = x.shape
    C_out = w.shape[-1]
    # TODO(synk): odd T would need PyTorch MaxPool1d's floor behavior (drop last frame).
    assert T % 2 == 0, "MaxPool1d(k=2,s=2) followed by mean assumes even T here"

    C_pad = 128 * pl.cdiv(C_out, 128)        # lane-dense output channels
    K = 3 * C_in
    K_pad = 128 * pl.cdiv(K, 128)            # full-depth MXU pass (matters on v5e)

    batch_block = _pick_batch_block(B, T, target_rows)
    nb = B // batch_block
    M_block = batch_block * T

    # bf16 at the HBM boundary (halves input DMA); reshape so each block is the full
    # last-two dims of its array.
    x_bf = x.astype(jnp.bfloat16).reshape(nb, M_block, C_in)

    # Weight: (3, C_in, C_out) -> (K_pad, C_pad) bf16 (zero rows/cols in the padding);
    # bias -> (1, C_pad) f32.
    w_flat = jnp.pad(w.reshape(K, C_out),
                     ((0, K_pad - K), (0, C_pad - C_out))).astype(jnp.bfloat16)
    b_pad = jnp.pad(b, (0, C_pad - C_out)).reshape(1, C_pad).astype(jnp.float32)

    out = pl.pallas_call(
        _cnn_feat_kernel,
        out_shape=jax.ShapeDtypeStruct((nb, batch_block, C_pad), jnp.float32),
        grid_spec=pltpu.PrefetchScalarGridSpec(
            num_scalar_prefetch=0,
            grid=(nb,),
            in_specs=[
                pl.BlockSpec((1, M_block, C_in), lambda i: (i, 0, 0)),
                pl.BlockSpec((K_pad, C_pad), lambda i: (0, 0)),
                pl.BlockSpec((1, C_pad), lambda i: (0, 0)),
            ],
            out_specs=pl.BlockSpec((1, batch_block, C_pad), lambda i: (i, 0, 0)),
            scratch_shapes=[pltpu.VMEM((M_block, K_pad), jnp.bfloat16)],
        ),
        compiler_params=pltpu.CompilerParams(
            dimension_semantics=("parallel",),      # batch blocks shard across TCs (v7x)
            vmem_limit_bytes=32 * 1024 * 1024,      # generation-safe; fits v7x 64 MiB/TC
        ),
    )(x_bf, w_flat, b_pad)

    return out.reshape(B, C_pad)[:, :C_out]


if __name__ == "__main__":
    # Small shapes consistent with the module: x of shape (batch, seq, input_dim).
    B, T, C_in, C_out = 2, 16, 32, 120

    key = jax.random.PRNGKey(0)
    kx, kw, kb = jax.random.split(key, 3)

    x = jax.random.normal(kx, (B, T, C_in), dtype=jnp.float32)

    # Conv1d weight is (C_out, C_in, 3) in PyTorch; store as (3, C_in, C_out).
    fan_in = C_in * 3
    bound = 1.0 / jnp.sqrt(fan_in)
    w_torch_layout = jax.random.uniform(
        kw, (C_out, C_in, 3), minval=-bound, maxval=bound, dtype=jnp.float32)
    w = jnp.transpose(w_torch_layout, (2, 1, 0))     # (3, C_in, C_out)
    b = jax.random.uniform(kb, (C_out,), minval=-bound, maxval=bound,
                           dtype=jnp.float32)

    out = cnn_feature_extractor(x, w, b)
    jax.block_until_ready(out)

    # Pure-JAX reference (same math: x quantized to bf16 at the boundary, bf16 matmul
    # operands, f32 accumulation).
    xb = x.astype(jnp.bfloat16).astype(jnp.float32)
    xp = jnp.pad(xb, ((0, 0), (1, 1), (0, 0)))
    taps = jnp.concatenate(
        [xp[:, 0:T, :], xp[:, 1:T + 1, :], xp[:, 2:T + 2, :]], axis=-1)   # (B, T, 3*C_in)
    y_ref = jnp.einsum("btk,ko->bto",
                       taps.astype(jnp.bfloat16),
                       w.reshape(3 * C_in, C_out).astype(jnp.bfloat16),
                       preferred_element_type=jnp.float32) + b[None, None, :]
    y_ref = jnp.maximum(y_ref, 0.0)
    y_ref = jnp.maximum(y_ref[:, 0::2, :], y_ref[:, 1::2, :])
    ref = jnp.mean(y_ref, axis=1)

    assert out.shape == (B, C_out)
    assert jnp.allclose(out, ref, atol=1e-2, rtol=1e-2)
    print("KERNEL_OK")
</pallas_src>

<mosaic_0001>
module attributes {stable_mosaic.version = 11 : i64} {
  func.func @_cnn_feat_kernel(%arg0: i32, %arg1: memref<1x16x32xbf16, #tpu.memory_space<vmem>>, %arg2: memref<128x128xbf16, #tpu.memory_space<vmem>>, %arg3: memref<1x128xf32, #tpu.memory_space<vmem>>, %arg4: memref<1x1x128xf32, #tpu.memory_space<vmem>>, %arg5: memref<16x128xbf16, #tpu.memory_space<vmem>>) attributes {dimension_semantics = [#tpu.dimension_semantics<parallel>], iteration_bounds = array<i64: 2>, scalar_prefetch = 0 : i64, scratch_operands = 1 : i64, tpu.core_type = #tpu.core_type<tc>, window_params = [{transform_indices = @transform_0, window_bounds = array<i64: 1, 16, 32>}, {pipeline_mode = #tpu.pipeline_mode<synchronous>, transform_indices = @transform_1, window_bounds = array<i64: 128, 128>}, {pipeline_mode = #tpu.pipeline_mode<synchronous>, transform_indices = @transform_2, window_bounds = array<i64: 1, 128>}, {transform_indices = @transform_3, window_bounds = array<i64: 1, 1, 128>}]} {
    %c0 = arith.constant 0 : index
    %c0_0 = arith.constant 0 : index
    %c0_1 = arith.constant 0 : index
    %0 = vector.load %arg1[%c0, %c0_0, %c0_1] : memref<1x16x32xbf16, #tpu.memory_space<vmem>>, vector<1x16x32xbf16>
    %1 = vector.shape_cast %0 : vector<1x16x32xbf16> to vector<16x32xbf16>
    %2 = arith.extf %1 : vector<16x32xbf16> to vector<16x32xf32>
    %3 = tpu.iota {dimensions = array<i32: 0>} : vector<16x1xi32>
    %c16_i32 = arith.constant 16 : i32
    %c0_i32 = arith.constant 0 : i32
    %4 = arith.cmpi eq, %c16_i32, %c0_i32 : i32
    %c1_i32 = arith.constant 1 : i32
    %5 = arith.select %4, %c1_i32, %c16_i32 : i32
    %6 = vector.broadcast %5 : i32 to vector<16x1xi32>
    %7 = arith.remsi %3, %6 : vector<16x1xi32>
    %c0_i32_2 = arith.constant 0 : i32
    %8 = vector.broadcast %c0_i32_2 : i32 to vector<16x1xi32>
    %9 = arith.cmpi ne, %7, %8 : vector<16x1xi32>
    %c0_i32_3 = arith.constant 0 : i32
    %10 = vector.broadcast %c0_i32_3 : i32 to vector<16x1xi32>
    %11 = arith.cmpi slt, %7, %10 : vector<16x1xi32>
    %c0_i32_4 = arith.constant 0 : i32
    %12 = arith.cmpi slt, %5, %c0_i32_4 : i32
    %13 = vector.broadcast %12 : i1 to vector<16x1xi1>
    %14 = vector.broadcast %13 : vector<16x1xi1> to vector<16x1xi1>
    %15 = arith.xori %11, %14 : vector<16x1xi1>
    %16 = arith.andi %15, %9 : vector<16x1xi1>
    %17 = vector.broadcast %5 : i32 to vector<16x1xi32>
    %18 = arith.addi %7, %17 : vector<16x1xi32>
    %19 = arith.select %16, %18, %7 : vector<16x1xi1>, vector<16x1xi32>
    %c0_i32_5 = arith.constant 0 : i32
    %20 = vector.broadcast %c0_i32_5 : i32 to vector<16x1xi32>
    %21 = arith.cmpi sgt, %19, %20 : vector<16x1xi32>
    %c1_i32_6 = arith.constant 1 : i32
    %22 = tpu.dynamic_rotate %2 by %c1_i32_6 dim 0 : vector<16x32xf32>, i32 -> vector<16x32xf32>
    %cst = arith.constant 0.000000e+00 : f32
    %23 = vector.shape_cast %21 : vector<16x1xi1> to vector<16x1xi1>
    %24 = vector.broadcast %23 : vector<16x1xi1> to vector<16x32xi1>
    %25 = vector.broadcast %cst : f32 to vector<16x32xf32>
    %26 = arith.select %24, %22, %25 : vector<16x32xi1>, vector<16x32xf32>
    %c15_i32 = arith.constant 15 : i32
    %27 = vector.broadcast %c15_i32 : i32 to vector<16x1xi32>
    %28 = arith.cmpi slt, %19, %27 : vector<16x1xi32>
    %c15_i32_7 = arith.constant 15 : i32
    %29 = tpu.dynamic_rotate %2 by %c15_i32_7 dim 0 : vector<16x32xf32>, i32 -> vector<16x32xf32>
    %cst_8 = arith.constant 0.000000e+00 : f32
    %30 = vector.shape_cast %28 : vector<16x1xi1> to vector<16x1xi1>
    %31 = vector.broadcast %30 : vector<16x1xi1> to vector<16x32xi1>
    %32 = vector.broadcast %cst_8 : f32 to vector<16x32xf32>
    %33 = arith.select %31, %29, %32 : vector<16x32xi1>, vector<16x32xf32>
    %cst_9 = arith.constant 0.000000e+00 : bf16
    %34 = vector.broadcast %cst_9 : bf16 to vector<16x32xbf16>
    %c0_10 = arith.constant 0 : index
    %c96 = arith.constant 96 : index
    %35 = vector.load %arg5[%c0_10, %c96] : memref<16x128xbf16, #tpu.memory_space<vmem>>, vector<16x32xbf16>
    tpu.vector_store %arg5[%c0_10, %c96], %34 {strides = array<i32>} : memref<16x128xbf16, #tpu.memory_space<vmem>>, vector<16x32xbf16>,
    %36 = arith.truncf %26 : vector<16x32xf32> to vector<16x32xbf16>
    %c0_11 = arith.constant 0 : index
    %c0_12 = arith.constant 0 : index
    %37 = vector.load %arg5[%c0_11, %c0_12] : memref<16x128xbf16, #tpu.memory_space<vmem>>, vector<16x32xbf16>
    tpu.vector_store %arg5[%c0_11, %c0_12], %36 {strides = array<i32>} : memref<16x128xbf16, #tpu.memory_space<vmem>>, vector<16x32xbf16>,
    %c0_13 = arith.constant 0 : index
    %c32 = arith.constant 32 : index
    %38 = vector.load %arg5[%c0_13, %c32] : memref<16x128xbf16, #tpu.memory_space<vmem>>, vector<16x32xbf16>
    tpu.vector_store %arg5[%c0_13, %c32], %1 {strides = array<i32>} : memref<16x128xbf16, #tpu.memory_space<vmem>>, vector<16x32xbf16>,
    %39 = arith.truncf %33 : vector<16x32xf32> to vector<16x32xbf16>
    %c0_14 = arith.constant 0 : index
    %c64 = arith.constant 64 : index
    %40 = vector.load %arg5[%c0_14, %c64] : memref<16x128xbf16, #tpu.memory_space<vmem>>, vector<16x32xbf16>
    tpu.vector_store %arg5[%c0_14, %c64], %39 {strides = array<i32>} : memref<16x128xbf16, #tpu.memory_space<vmem>>, vector<16x32xbf16>,
    %c0_15 = arith.constant 0 : index
    %c0_16 = arith.constant 0 : index
    %41 = vector.load %arg5[%c0_15, %c0_16] : memref<16x128xbf16, #tpu.memory_space<vmem>>, vector<16x128xbf16>
    %c0_17 = arith.constant 0 : index
    %c0_18 = arith.constant 0 : index
    %42 = vector.load %arg2[%c0_17, %c0_18] : memref<128x128xbf16, #tpu.memory_space<vmem>>, vector<128x128xbf16>
    %cst_19 = arith.constant dense<0.000000e+00> : vector<16x128xf32>
    %43 = tpu.matmul %41, %42, %cst_19 {dimension_numbers = #tpu.dot_dimension_numbers<[1], [0], [0], [1], [0, 0, 1, 1], [], []>} : vector<16x128xbf16>, vector<128x128xbf16>, vector<16x128xf32> -> vector<16x128xf32>
    %c0_20 = arith.constant 0 : index
    %c0_21 = arith.constant 0 : index
    %44 = vector.load %arg3[%c0_20, %c0_21] : memref<1x128xf32, #tpu.memory_space<vmem>>, vector<1x128xf32>
    %45 = vector.broadcast %44 : vector<1x128xf32> to vector<16x128xf32>
    %46 = arith.addf %43, %45 : vector<16x128xf32>
    %cst_22 = arith.constant 0.000000e+00 : f32
    %47 = vector.broadcast %cst_22 : f32 to vector<16x128xf32>
    %48 = arith.maximumf %46, %47 : vector<16x128xf32>
    %c15_i32_23 = arith.constant 15 : i32
    %49 = tpu.dynamic_rotate %48 by %c15_i32_23 dim 0 : vector<16x128xf32>, i32 -> vector<16x128xf32>
    %50 = arith.maximumf %48, %49 : vector<16x128xf32>
    %c2_i32 = arith.constant 2 : i32
    %c0_i32_24 = arith.constant 0 : i32
    %51 = arith.cmpi eq, %c2_i32, %c0_i32_24 : i32
    %c1_i32_25 = arith.constant 1 : i32
    %52 = arith.select %51, %c1_i32_25, %c2_i32 : i32
    %53 = vector.broadcast %52 : i32 to vector<16x1xi32>
    %54 = arith.remsi %19, %53 : vector<16x1xi32>
    %c0_i32_26 = arith.constant 0 : i32
    %55 = vector.broadcast %c0_i32_26 : i32 to vector<16x1xi32>
    %56 = arith.cmpi ne, %54, %55 : vector<16x1xi32>
    %c0_i32_27 = arith.constant 0 : i32
    %57 = vector.broadcast %c0_i32_27 : i32 to vector<16x1xi32>
    %58 = arith.cmpi slt, %54, %57 : vector<16x1xi32>
    %c0_i32_28 = arith.constant 0 : i32
    %59 = arith.cmpi slt, %52, %c0_i32_28 : i32
    %60 = vector.broadcast %59 : i1 to vector<16x1xi1>
    %61 = vector.broadcast %60 : vector<16x1xi1> to vector<16x1xi1>
    %62 = arith.xori %58, %61 : vector<16x1xi1>
    %63 = arith.andi %62, %56 : vector<16x1xi1>
    %64 = vector.broadcast %52 : i32 to vector<16x1xi32>
    %65 = arith.addi %54, %64 : vector<16x1xi32>
    %66 = arith.select %63, %65, %54 : vector<16x1xi1>, vector<16x1xi32>
    %c0_i32_29 = arith.constant 0 : i32
    %67 = vector.broadcast %c0_i32_29 : i32 to vector<16x1xi32>
    %68 = arith.cmpi eq, %66, %67 : vector<16x1xi32>
    %cst_30 = arith.constant 0.000000e+00 : f32
    %69 = vector.shape_cast %68 : vector<16x1xi1> to vector<16x1xi1>
    %70 = vector.broadcast %69 : vector<16x1xi1> to vector<16x128xi1>
    %71 = vector.broadcast %cst_30 : f32 to vector<16x128xf32>
    %72 = arith.select %70, %50, %71 : vector<16x128xi1>, vector<16x128xf32>
    %73 = vector.shape_cast %72 : vector<16x128xf32> to vector<1x16x128xf32>
    %cst_31 = arith.constant dense<0.000000e+00> : vector<1x128xf32>
    %74 = vector.multi_reduction <add>, %73, %cst_31 [1] : vector<1x16x128xf32> to vector<1x128xf32>
    %cst_32 = arith.constant 1.250000e-01 : f32
    %75 = vector.broadcast %cst_32 : f32 to vector<1x128xf32>
    %76 = arith.mulf %74, %75 : vector<1x128xf32>
    %c0_33 = arith.constant 0 : index
    %c0_34 = arith.constant 0 : index
    %c0_35 = arith.constant 0 : index
    %77 = vector.load %arg4[%c0_33, %c0_34, %c0_35] : memref<1x1x128xf32, #tpu.memory_space<vmem>>, vector<1x1x128xf32>
    %78 = vector.shape_cast %77 : vector<1x1x128xf32> to vector<1x128xf32>
    %79 = vector.shape_cast %76 : vector<1x128xf32> to vector<1x1x128xf32>
    tpu.vector_store %arg4[%c0_33, %c0_34, %c0_35], %79 {strides = array<i32>} : memref<1x1x128xf32, #tpu.memory_space<vmem>>, vector<1x1x128xf32>,
    return
  }
  func.func @transform_0(%arg0: i32) -> (i32, i32, i32) {
    %c0_i32 = arith.constant 0 : i32
    %c0_i32_0 = arith.constant 0 : i32
    %c0_i32_1 = arith.constant 0 : i32
    return %arg0, %c0_i32, %c0_i32_0 : i32, i32, i32
  }
  func.func @transform_1(%arg0: i32) -> (i32, i32) {
    %c0_i32 = arith.constant 0 : i32
    %c0_i32_0 = arith.constant 0 : i32
    %c0_i32_1 = arith.constant 0 : i32
    return %c0_i32, %c0_i32_0 : i32, i32
  }
  func.func @transform_2(%arg0: i32) -> (i32, i32) {
    %c0_i32 = arith.constant 0 : i32
    %c0_i32_0 = arith.constant 0 : i32
    %c0_i32_1 = arith.constant 0 : i32
    return %c0_i32, %c0_i32_0 : i32, i32
  }
  func.func @transform_3(%arg0: i32) -> (i32, i32, i32) {
    %c0_i32 = arith.constant 0 : i32
    %c0_i32_0 = arith.constant 0 : i32
    %c0_i32_1 = arith.constant 0 : i32
    return %arg0, %c0_i32, %c0_i32_0 : i32, i32, i32
  }
}

</mosaic_0001>

<bundles_post_ra>
// kernel: tpu_custom_call.1
= control target key start
LH: loop header
LB: loop body
LE: loop exit
PB: predicated region body
PF: predicated region fallthrough
CT: control target
= control target key end

     0   :  { %8 = vsyncpa [#allocation4], 0  ;;  %s1071_s0 = inlined_call_operand.hbm [shape: bf16[2,16,32], index: 0, kind: input, shape index: {}]   ;;  %s1072_s1 = inlined_call_operand.hbm [shape: bf16[128,128], index: 1, kind: input, shape index: {}]   ;;  %s1073_s2 = inlined_call_operand.vmem [shape: f32[1,128], index: 2, kind: input, shape index: {}]   ;;  %s1074_s3 = inlined_call_operand.hbm [shape: f32[2,1,128], index: 3, kind: output, shape index: {}]  }
   0x1   :  { %10 = vsyncpa [#allocation4 + $0x1], 0 }
   0x2   :  { %11 = vsyncpa [#allocation7], 0 }
   0x3   :  { %12 = vsyncpa [#allocation5], 0 }
   0x4   :  { %14 = vsyncpa [#allocation5 + $0x1], 0  ;;  %s821_s12 = smov 0   ;;  %s823_s13 = smov 0  }
   0x5   :  { %s825_s14 = smov 0   ;;  %s827_s15 = smov 0  }
   0x6 LB: > { %s842_s16 = sadd.s32 4294967295, %s789_s15   ;;  %s534_s17 = sadd.s32 4294967294, %s789_s15   ;;  %s789_s15 = sphi %s827_s15, %s1098_s15   ;;  %s785_s14 = sphi %s825_s14, %s1097_s14   ;;  %s781_s13 = sphi %s823_s13, %s1096_s13   ;;  %s777_s12 = sphi %s821_s12, %s1095_s12  }
   0x7   : > { %p40_p0 = scmp.ne.s32.totalorder %s781_s13, %s777_s12  ;;  %p1075_p1 = scmp.eq.s32.totalorder %s842_s16, 0 }
   0x8   : > { %p112_p3 = scmp.eq.s32.totalorder %s534_s17, 1  ;;  %p535_p5 = scmp.ge.s32.totalorder %s789_s15, 1 }
   0x9   : > { %p851_p4 = por %p1075_p1, %p40_p0  ;;  %p119_p7 = scmp.lt.s32.totalorder %s789_s15, 3 }
   0xa   : > { %p856_p6 = por %p112_p3, %p40_p0  ;;  %s791_s21 = smov [#allocation6]  }
   0xb   : > { %s1078_s18 = scalar_select %p851_p4, 1, 0 }
   0xc   : > { %s1079_s19 = scalar_select %p856_p6, 1, 0 }
   0xd   : > { %p861_p8 = pnand %p535_p5, %p119_p7  ;;  %s131_s22 = sshll.u32 %s791_s21, 4  ;;  %s865_s22 = int_to_ptr.vmem [resolvable:$true] %s131_s22 }
   0xe   : > { %s877_s24 = sadd.s32 1, %s789_s15   ;;  %s27_s25 = sadd.s32 1, %s785_s14 }
   0xf   : > { %s1080_s20 = scalar_select %p861_p8, 1, 0 }
  0x10   : > { %p595_p9 = pneg %p861_p8  ;;  %s24_s26 = ssub.s32 %s789_s15, %s877_s24 }
  0x11   : > { %s661_s29 = scalar_lea.hbm %s1072_s1, 1024 }
  0x12   : > { %p872_p11 = pnand %p595_p9, %p1075_p1  ;;  %p662_p12 = scmp.ne.s32.totalorder %s1072_s1, %s661_s29 }
  0x13   : > { %p668_p5 = scmp.lt.u32.totalorder %s661_s29, %s1072_s1 }
  0x14   : > { %p663_p13 = pneg %p872_p11 }
  0x16   : > { %p664_p0 = pnand %p663_p13, %p662_p12 }
  0x18   : > { %p665_p3 = pneg %p664_p0 }
  0x1a   : > { %p670_p7 = pnand %p668_p5, %p665_p3 }
  0x1c   : > { %673 = shalt.err (!%p670_p7)
}
  0x1d   : > { %s674_s7 = scalar_lea.vmem %s865_s22, 1024  ;;  %p682_p2 = scmp.lt.s32.totalorder %s865_s22, %s865_s22 }
  0x1e   : > { %p675_p9 = scmp.ne.s32.totalorder %s865_s22, %s674_s7  ;;  %p683_p6 = scmp.lt.s32.totalorder %s674_s7, %s674_s7 }
  0x20   : > { %p677_p10 = pnand %p675_p9, %p663_p13  ;;  %p684_p4 = por %p683_p6, %p682_p2 }
  0x22   : > { %p678_p1 = pneg %p677_p10 }
  0x24   : > { %p685_p8 = pnand %p684_p4, %p678_p1 }
  0x26   : > { %688 = shalt.err (!%p685_p8)
}
  0x27   : > { %s792_s8 = smov 64   ;;  %s793_s9 = smov 4  }
  0x28   : > { %598 = dma.hbm_to_vmem [thread:$0]  (!%p872_p11), %s1072_s1, 1024, %s865_s22, [#allocation7], %s792_s8, %s792_s8, %s793_s9  }
  0x29   : > { %p25_p1 = scmp.eq.s32.totalorder %s24_s26, 0  ;;  %p34_p2 = scmp.ne.s32.totalorder %s785_s14, %s781_s13 }
  0x2a   : > { %p35_p4 = scmp.eq.s32.totalorder %s789_s15, 0  ;;  %p608_p6 = scmp.lt.s32.totalorder %s789_s15, 2 }
  0x2b   : > { %s911_s17 = scalar_select %p25_p1, %s785_s14, %s27_s25  }
  0x2c   : > { %p36_p8 = por %p35_p4, %p34_p2  ;;  %p1082_p10 = scmp.eq.s32.totalorder %s842_s16, 1 }
  0x2d   : > { %s148_s23 = sand.u32 1, %s785_s14   ;;  %s557_s27 = sshll.u32 %s789_s15, 7 }
  0x2e   : > { %p915_p12 = por %p1082_p10, %p34_p2  ;;  %s538_s28 = sshll.u32 %s148_s23, 3 }
  0x2f   : > { %s924_s4 = scalar_lea.hbm %s1071_s0, %s557_s27  ;;  %s152_s22 = scalar_lea.vmem [#allocation3], %s538_s28 }
  0x30   : > { %s159_s25 = sshll.u32 %s152_s22, 4  ;;  %p926_p11 = pnand %p608_p6, %p36_p8  ;;  %s930_s25 = int_to_ptr.vmem [resolvable:$true] %s159_s25 }
  0x31   : > { %s932_s5 = scalar_lea.sflag [#allocation4], %s148_s23  ;;  %s689_s6 = scalar_lea.hbm %s924_s4, 128 }
  0x32   : > { %p690_p13 = scmp.ne.s32.totalorder %s924_s4, %s689_s6  ;;  %p691_p0 = pneg %p926_p11 }
  0x33   : > { %s694_s11 = scalar_lea.hbm %s1071_s0, 256  ;;  %p695_p7 = scmp.lt.u32.totalorder %s924_s4, %s1071_s0 }
  0x34   : > { %p692_p3 = pnand %p691_p0, %p690_p13  ;;  %p696_p9 = scmp.lt.u32.totalorder %s694_s11, %s689_s6 }
  0x35   : > { %p698_p2 = scmp.lt.u32.totalorder %s689_s6, %s924_s4 }
  0x36   : > { %p693_p5 = pneg %p692_p3  ;;  %p697_p1 = por %p696_p9, %p695_p7 }
  0x38   : > { %p699_p4 = por %p698_p2, %p697_p1 }
  0x3a   : > { %p700_p6 = pnand %p699_p4, %p693_p5 }
  0x3c   : > { %703 = shalt.err (!%p700_p6)
}
  0x3d   : > { %s704_s23 = scalar_lea.vmem %s930_s25, 128  ;;  %s794_s29 = smov [#allocation3]  }
  0x3e   : > { %p705_p8 = scmp.ne.s32.totalorder %s930_s25, %s704_s23  ;;  %s709_s30 = sshll.u32 %s794_s29, 4  ;;  %s710_s30 = int_to_ptr.vmem [resolvable:$false] %s709_s30 }
  0x3f   : > { %s711_s22 = scalar_lea.vmem %s710_s30, 256  ;;  %p712_p3 = scmp.lt.s32.totalorder %s930_s25, %s710_s30 }
  0x40   : > { %p707_p10 = pnand %p705_p8, %p691_p0  ;;  %p713_p7 = scmp.lt.s32.totalorder %s711_s22, %s704_s23 }
  0x42   : > { %p708_p13 = pneg %p707_p10  ;;  %p714_p9 = por %p713_p7, %p712_p3 }
  0x44   : > { %p715_p1 = pnand %p714_p9, %p708_p13 }
  0x46   : > { %718 = shalt.err (!%p715_p1)
}
  0x47   : > { %602 = dma.hbm_to_vmem [thread:$0]  (!%p926_p11), %s924_s4, 128, %s930_s25, %s932_s5, %s792_s8, %s792_s8, %s793_s9  }
  0x48   : > { %p1085_p0 = scmp.ne.s32.totalorder %s1080_s20, 0 }
  0x49   : > { %s966_s6 = sand.u32 (!%p1085_p0), 1, %s781_s13   ;;  %p1086_p5 = scmp.ne.s32.totalorder (!%p1085_p0), %s1078_s18, 0 }
  0x4a   : > { %171 = sbr.rel (%p1085_p0) target bundleno = 474 (0x1da), region = 32  ;;  %s542_s7 = sshll.u32 (!%p1085_p0), %s966_s6, 3 }
  0x4b   : > { %s174_s10 = scalar_lea.sflag (!%p1085_p0), [#allocation4], %s966_s6  ;;  %s177_s11 = scalar_lea.vmem (!%p1085_p0), [#allocation3], %s542_s7 }
  0x51   : > { %764 = dma.done.wait (%p1086_p5), %s174_s10, 128  }
  0x52   : > { %766 = vsyncadd (%p1086_p5), %s174_s10, 4294967168  ;;  %p1087_p2 = scmp.eq.s32.totalorder %s842_s16, 0 }
  0x54   : > { %768 = dma.done.wait (%p1087_p2), [#allocation7], 1024   ;;  %p1088_p11 = pmov %p1087_p2 }
  0x55   : > { %v208_v0 = vlaneseq  ;;  %vm261_vm0 = vcmask 1048320   ;;  %v795_v1 = vmov 0.0   ;;  %v796_v3 = vmov 0   ;;  %v204_v7 = vld [vmem:[%s177_s11] sm:$0xff]   ;;  %v652_v10 = vld [vmem:[#allocation6] sm:$0xff]   ;;  %s798_s18 = smov 32  }
  0x56   : > { %770 = vsyncadd (%p1088_p11), [#allocation7], 4294966272  ;;  %567 = vmatprep.subr.bf16.mxu0 %v795_v1  ;;  %262 = vst.msk [vmem:[#allocation2] sm:$0xff] %vm261_vm0, %v796_v3  ;;  %vm797_vm1 = vmmov 0   ;;  %v207_v8 = vunpack.c.h.bf16 %v204_v7  ;;  %v206_v9 = vunpack.c.l.bf16 %v204_v7  ;;  %271 = vrot.lane.b32.xlu0 %v204_v7, %s798_s18  ;;  %v653_v17 = vld [vmem:[#allocation6 + $0x8] sm:$0xff]   ;;  %v654_v24 = vld [vmem:[#allocation6 + $0x10] sm:$0xff]  }
  0x57   : > { %v978_v2 = vshrl.u32 %v208_v0, 7  ;;  %583 = vmatprep.mubr.msk.bf16.mxu0 %vm797_vm1, %v795_v1  ;;  %568 = vmatpush3.bf16.msra.mxu0 %v652_v10  ;;  %vm264_vm6 = vcmask 261120   ;;  %s799_s20 = smov 64   ;;  %v655_v27 = vld [vmem:[#allocation6 + $0x18] sm:$0xff]   ;;  %v656_v28 = vld [vmem:[#allocation6 + $0x20] sm:$0xff]   ;;  %v657_v29 = vld [vmem:[#allocation6 + $0x28] sm:$0xff]  }
  0x58   : > { %v238_v13 = vrot.slane %v207_v8, 7  ;;  %v251_v14 = vrot.slane %v207_v8, 1  ;;  %v237_v15 = vrot.slane %v206_v9, 7  ;;  %v250_v16 = vrot.slane %v206_v9, 1  ;;  %569 = vmatprep.subr.bf16.mxu0 %v795_v1  ;;  %v658_v30 = vld [vmem:[#allocation6 + $0x30] sm:$0xff]   ;;  %v659_v31 = vld [vmem:[#allocation6 + $0x38] sm:$0xff]  }
  0x59   : > { %v981_v4 = vadd.s32 8, %v978_v2  ;;  %v215_v5 = vand.u32 15, %v978_v2  ;;  %vm239_vm2 = vcmp.lt.s32.totalorder %v978_v2, 1  ;;  %vm252_vm3 = vcmp.lt.s32.totalorder %v978_v2, 7  ;;  %v545_v35 = vld [vmem:[%s1073_s2] ss:$0 sm:$0xff] }
  0x5a   : > { %v240_v18 = vsel %vm239_vm2, %v237_v15, %v238_v13  ;;  %v241_v19 = vsel %vm239_vm2, %v238_v13, %v237_v15  ;;  %v253_v20 = vsel %vm252_vm3, %v250_v16, %v251_v14  ;;  %v254_v21 = vsel %vm252_vm3, %v251_v14, %v250_v16  ;;  %s554_s4 = sshll.u32 %s842_s16, 4  ;;  %s202_s25 = scalar_lea.vmem [#allocation8], %s966_s6 }
  0x5b   : > { %v222_v6 = vand.u32 15, %v981_v4  ;;  %vm989_vm4 = vcmp.gt.s32.totalorder %v215_v5, 0  ;;  %570 = vmatpush3.bf16.msra.mxu0 %v653_v17  ;;  %vm274_vm7 = vcmask 523520   ;;  %vm281_vm8 = vcmask 785920   ;;  %s458_s26 = sshll.u32 %s202_s25, 4  ;;  %s1027_s28 = scalar_lea.hbm %s1074_s3, %s554_s4  ;;  %s1029_s26 = int_to_ptr.vmem [resolvable:$true] %s458_s26 }
  0x5c   : > { %v246_v22 = vsel %vm989_vm4, %v241_v19, 0.0  ;;  %571 = vmatprep.subr.bf16.mxu0 %v795_v1  ;;  %v408_v44 = vand.u32 1, %v215_v5  ;;  %s446_s23 = scalar_lea.sflag [#allocation5], %s966_s6  ;;  %s719_s29 = scalar_lea.vmem %s1029_s26, 16 }
  0x5d   : > { %vm995_vm5 = vcmp.lt.s32.totalorder %v222_v6, 15  ;;  %v263_v25 = vpack.c.bf16 %v240_v18, %v246_v22  ;;  %v415_v45 = vand.u32 1, %v222_v6  ;;  %p720_p4 = scmp.ne.s32.totalorder %s1029_s26, %s719_s29  ;;  %s800_s16 = smov [#allocation8]  }
  0x5e   : > { %v260_v23 = vsel %vm995_vm5, %v254_v21, 0.0  ;;  %vm428_vm9 = vcmp.eq.s32.totalorder %v408_v44, 0  ;;  %s723_s30 = sshll.u32 %s800_s16, 4  ;;  %s724_s30 = int_to_ptr.vmem [resolvable:$false] %s723_s30 }
  0x5f   : > { %v276_v26 = vpack.c.bf16 %v260_v23, %v253_v20  ;;  %265 = vst.msk [vmem:[#allocation2] sm:$0xff] %vm264_vm6, %v263_v25  ;;  %572 = vmatpush3.bf16.msra.mxu0 %v654_v24  ;;  %vm429_vm10 = vcmp.eq.s32.totalorder %v415_v45, 0  ;;  %p721_p6 = pnand %p720_p4, %p915_p12  ;;  %s725_s22 = scalar_lea.vmem %s724_s30, 32 }
  0x60   : > { %573 = vmatprep.subr.bf16.mxu0 %v795_v1  ;;  %p726_p10 = scmp.lt.s32.totalorder %s1029_s26, %s724_s30  ;;  %p727_p13 = scmp.lt.s32.totalorder %s725_s22, %s719_s29 }
  0x61   : > { %278 = vrot.lane.b32.xlu0 %v276_v26, %s799_s20  ;;  %p722_p8 = pneg %p721_p6 }
  0x62   : > { %p728_p3 = por %p727_p13, %p726_p10 }
  0x63   : > { %574 = vmatpush3.bf16.msra.mxu0 %v655_v27 }
  0x64   : > { %575 = vmatprep.subr.bf16.mxu0 %v795_v1  ;;  %p729_p7 = pnand %p728_p3, %p722_p8 }
  0x67   : > { %576 = vmatpush3.bf16.msra.mxu0 %v656_v28 }
  0x68   : > { %577 = vmatprep.subr.bf16.mxu0 %v795_v1 }
  0x6b   : > { %578 = vmatpush3.bf16.msra.mxu0 %v657_v29 }
  0x6c   : > { %579 = vmatprep.subr.bf16.mxu0 %v795_v1 }
  0x6f   : > { %580 = vmatpush3.bf16.msra.mxu0 %v658_v30 }
  0x70   : > { %581 = vmatprep.subr.bf16.mxu0 %v795_v1 }
  0x73   : > { %582 = vmatpush3.bf16.msra.mxu0 %v659_v31 }
  0xc8   : > { %v272_v32 = vpop.permute.xlu0 %271 }
  0xc9   : > { %275 = vst.msk [vmem:[#allocation2] sm:$0xff] %vm274_vm7, %v272_v32 }
  0xd3   : > { %v279_v33 = vpop.permute.xlu0 %278 }
  0xd4   : > { %282 = vst.msk [vmem:[#allocation2] sm:$0xff] %vm281_vm8, %v279_v33 }
  0xdb   : > { %v283_v34 = vld [vmem:[#allocation2] sm:$0xff] }
  0xdc   : > { %584 = vmatmul.mubr.bf16.vlgmr.msra.gmra.mrb[0].mxu0 %v283_v34 }
 0x1af   : > { %v389_v36 = vpop.f32.mrb[0].mxu0 }
 0x1b0   : > { %v390_v37 = vadd.f32 %v545_v35, %v389_v36  ;;  %v585_v38 = vpop.f32.mrb[1].mxu0 }
 0x1b1   : > { %v392_v39 = vpop.f32.mrb[2].mxu0 }
 0x1b2   : > { %v396_v40 = vmax.f32 %v390_v37, 0.0  ;;  %v393_v41 = vadd.f32 %v545_v35, %v392_v39  ;;  %v586_v42 = vpop.f32.mrb[3].mxu0 }
 0x1b4   : > { %v397_v43 = vmax.f32 %v393_v41, 0.0  ;;  %v398_v46 = vrot.slane %v396_v40, 1 }
 0x1b6   : > { %v399_v47 = vrot.slane %v397_v43, 1 }
 0x1b8   : > { %v400_v48 = vsel %vm252_vm3, %v398_v46, %v399_v47  ;;  %v401_v49 = vsel %vm252_vm3, %v399_v47, %v398_v46 }
 0x1b9   : > { %v402_v50 = vmax.f32 %v396_v40, %v400_v48  ;;  %v403_v51 = vmax.f32 %v397_v43, %v401_v49 }
 0x1bb   : > { %v434_v52 = vsel %vm428_vm9, %v402_v50, 0.0  ;;  %v435_v53 = vsel %vm429_vm10, %v403_v51, 0.0 }
 0x1bc   : > { %v436_v54 = vadd.f32 %v435_v53, %v434_v52 }
 0x1be   : > { %v437_v55 = vrot.slane %v436_v54, 4 }
 0x1c0   : > { %v438_v56 = vadd.f32 %v437_v55, %v436_v54 }
 0x1c2   : > { %v439_v57 = vrot.slane %v438_v56, 2 }
 0x1c4   : > { %v440_v58 = vadd.f32 %v439_v57, %v438_v56 }
 0x1c6   : > { %v441_v59 = vrot.slane %v440_v58, 1 }
 0x1c8   : > { %v442_v60 = vadd.f32 %v441_v59, %v440_v58 }
 0x1ca   : > { %v443_v61 = vmul.f32 0.125, %v442_v60 }
 0x1cc   : > { %444 = vst [vmem:[%s202_s25] sm:$0x1] %v443_v61 }
 0x1cd   : > { %732 = shalt.err (!%p729_p7)
}
 0x1ce   : > { %s733_s6 = scalar_lea.hbm %s1027_s28, 16  ;;  %s737_s11 = scalar_lea.hbm %s1074_s3, 32 }
 0x1cf   : > { %p734_p9 = scmp.ne.s32.totalorder %s1027_s28, %s733_s6  ;;  %p738_p5 = scmp.lt.u32.totalorder %s1027_s28, %s1074_s3 }
 0x1d0   : > { %p739_p2 = scmp.lt.u32.totalorder %s737_s11, %s733_s6  ;;  %p741_p4 = scmp.lt.u32.totalorder %s733_s6, %s1027_s28 }
 0x1d1   : > { %p735_p1 = pnand %p734_p9, %p915_p12 }
 0x1d2   : > { %p740_p11 = por %p739_p2, %p738_p5 }
 0x1d3   : > { %p736_p0 = pneg %p735_p1 }
 0x1d4   : > { %p742_p6 = por %p741_p4, %p740_p11 }
 0x1d6   : > { %p743_p8 = pnand %p742_p6, %p736_p0 }
 0x1d8   : > { %746 = shalt.err (!%p743_p8)
}
 0x1d9   : > { %593 = dma.vmem_to_hbm [thread:$0]  (%p915_p12), %s1029_s26, 16, %s1027_s28, %s446_s23  }
 0x1da PF: > { %s470_s8 = sand.u32 1, %s777_s12   ;;  %p1093_p10 = scmp.ne.s32.totalorder %s1079_s19, 0 }
 0x1db   : > { %p1094_p13 = scmp.ge.s32.totalorder %s789_s15, 2  ;;  %s471_s9 = scalar_lea.sflag [#allocation5], %s470_s8 }
 0x1dd   : > { %p604_p3 = pnand %p1094_p13, %p1093_p10 }
 0x1df   : > { %772 = dma.done.wait (!%p604_p3), %s471_s9, 16  }
 0x1e0   : > { %774 = vsyncadd (!%p604_p3), %s471_s9, 4294967280  ;;  %p17_p7 = scmp.ge.s32.totalorder %s877_s24, 4   ;;  %s1095_s12 = smov %s781_s13 }
 0x1e1   : > { %s1096_s13 = smov %s785_s14  ;;  %s1097_s14 = smov %s911_s17 }
 0x1e2   : > { %s1098_s15 = smov %s877_s24  ;;  %19 = sbr.rel (!%p17_p7) target bundleno = 6 (0x6), region = 81 }
 0x1e9   :  { %475 = vsyncpa [#allocation4], 1 }
 0x1ea   :  { %477 = vsyncpa [#allocation4 + $0x1], 1 }
 0x1eb   :  { %478 = vsyncpa [#allocation7], 1 }
 0x1ec   :  { %479 = vsyncpa [#allocation5], 1 }
 0x1ed   :  { %481 = vsyncpa [#allocation5 + $0x1], 1 }

</bundles_post_ra>
